<compile_context>
chip_gen: v5e
topology: v5e:2x2
jax: 0.10.0
libtpu: 0.0.40
codegen_flags: <defaults>
</compile_context>

<pallas_src>
import functools

import jax
import jax.numpy as jnp
from jax.experimental import pallas as pl
from jax.experimental.pallas import tpu as pltpu


def _round_up(v, m):
    return ((v + m - 1) // m) * m


def _focal_loss_kernel(logits_ref, target_ref, out_ref, acc_ref, *,
                       gamma, alpha, hw, s_rows, j_grid, needs_mask):
    j = pl.program_id(2)

    @pl.when(j == 0)
    def _():
        acc_ref[...] = jnp.zeros_like(acc_ref)

    x = logits_ref[0].astype(jnp.float32)          # (C, S, 128)
    tgt = target_ref[0, 0]                         # (S, 128) int32
    c = x.shape[0]

    if c == 2:
        # Binary specialization: log p_t = -softplus(x_other - x_target).
        is0 = tgt == 0
        xt = jnp.where(is0, x[0], x[1])
        xo = jnp.where(is0, x[1], x[0])
        z = xo - xt
        # numerically stable softplus: max(z,0) + log1p(exp(-|z|))
        logpt = -(jnp.maximum(z, 0.0) + jnp.log1p(jnp.exp(-jnp.abs(z))))
        at = jnp.where(is0, alpha[0], alpha[1])
    else:
        # log_softmax over the class (leading/sublane-group) axis.
        m = jnp.max(x, axis=0, keepdims=True)
        lse = jnp.log(jnp.sum(jnp.exp(x - m), axis=0, keepdims=True)) + m
        logp = x - lse                              # (C, S, 128)
        # gather at target class via a select chain (no float one-hot).
        logpt = logp[0]
        at = jnp.full_like(logpt, alpha[0])
        for k in range(1, c):
            sel = tgt == k
            logpt = jnp.where(sel, logp[k], logpt)
            at = jnp.where(sel, alpha[k], at)

    weighted = at * logpt
    g = float(gamma)
    if g == 0.0:
        loss = -weighted                            # (1 - pt)**0 == 1
    else:
        pt = jnp.exp(logpt)
        one_minus_pt = 1.0 - pt
        if g.is_integer() and 1.0 <= g <= 4.0:
            mod = one_minus_pt
            for _ in range(int(g) - 1):
                mod = mod * one_minus_pt
        else:
            mod = one_minus_pt ** g                 # general fallback
        loss = -mod * weighted                      # (S, 128)

    if needs_mask:
        # Logical global indices (pre-clamp): padded rows/lanes and the
        # oversized-split duplicate tile all land at >= hw and are zeroed.
        g0 = (pl.program_id(0) * j_grid + j) * s_rows
        row = jax.lax.broadcasted_iota(jnp.int32, loss.shape, 0) + g0
        lane = jax.lax.broadcasted_iota(jnp.int32, loss.shape, 1)
        loss = jnp.where(row * 128 + lane < hw, loss, 0.0)

    # Fold (S, 128) -> (8, 128) with free sublane-group adds, accumulate.
    acc_ref[...] += jnp.sum(loss.reshape(s_rows // 8, 8, 128), axis=0)

    @pl.when(j == pl.num_programs(2) - 1)
    def _():
        total = jnp.sum(acc_ref[...])               # one reduce per image/half
        out_ref[...] = jnp.zeros((1, 1, 1, 128), jnp.float32) + total


def _pick_tile_rows(nb, c, itemsize, tile_hw):
    # Double-buffered footprint per 128-lane row for both streams.
    bytes_per_row = 2 * (c * 128 * itemsize) + 2 * (128 * 4)
    budget = 12 * 1024 * 1024   # fits v5e 16 MiB scoped default; <<32 MiB v6e/v7x
    s_budget = max(8, budget // bytes_per_row)
    s_req = max(8, int(tile_hw) // 128)
    s = min(s_budget, s_req, _round_up(nb, 8))
    return max(8, (s // 8) * 8)


def focal_loss(x, target, gamma=0.0, alpha=(0.5, 0.5), size_average=True,
               tile_hw=262144):
    """Mirrors FocalLoss.forward.

    x:      (N, C, H, W) logits (any float dtype), or already (rows, C).
    target: (N, H, W) int class indices, or already (rows,).
    """
    if x.ndim > 2:
        n, c = x.shape[0], x.shape[1]
        x3 = x.reshape(n, c, -1)                    # (N, C, HW) -- pure reshape
    else:
        # already (rows, C): move classes to the leading axis (small transpose)
        c = x.shape[1]
        x3 = jnp.transpose(x, (1, 0))[None]         # (1, C, rows)
        n = 1
    hw = x3.shape[-1]
    tgt3 = target.reshape(n, 1, hw).astype(jnp.int32)

    if len(alpha) < c:
        raise ValueError(
            f"alpha has {len(alpha)} entries but input has {c} classes")
    alpha_c = tuple(float(a) for a in alpha[:c])

    # Fold the spatial axis into (rows, 128).  Copy-free when HW % 128 == 0;
    # otherwise a small zero-pad copy (pad values are masked in-kernel).
    nb = _round_up(hw, 128) // 128
    hw_pad = nb * 128
    if hw_pad != hw:
        x3 = jnp.pad(x3, ((0, 0), (0, 0), (0, hw_pad - hw)))
        tgt3 = jnp.pad(tgt3, ((0, 0), (0, 0), (0, hw_pad - hw)))
    x4 = x3.reshape(n, c, nb, 128)
    tgt4 = tgt3.reshape(n, 1, nb, 128)

    itemsize = jnp.dtype(x.dtype).itemsize
    s_rows = _pick_tile_rows(nb, c, itemsize, tile_hw)
    nb_s = _round_up(nb, s_rows) // s_rows          # row-blocks along spatial

    # v7x megacore: split the spatial range across 2 cores when the batch axis
    # alone can't balance them (odd N).  Harmless on single-TC v5e/v6e.
    n_split = 2 if (n % 2 == 1 and nb_s >= 2) else 1
    j_grid = _round_up(nb_s, n_split) // n_split

    needs_mask = (n_split * j_grid * s_rows * 128) != hw

    def logits_map(s, i, j):
        return (i, 0, jnp.minimum(s * j_grid + j, nb_s - 1), 0)

    def target_map(s, i, j):
        return (i, 0, jnp.minimum(s * j_grid + j, nb_s - 1), 0)

    kernel = functools.partial(
        _focal_loss_kernel, gamma=float(gamma), alpha=alpha_c, hw=hw,
        s_rows=s_rows, j_grid=j_grid, needs_mask=needs_mask)

    partials = pl.pallas_call(
        kernel,
        out_shape=jax.ShapeDtypeStruct((n_split, n, 1, 128), jnp.float32),
        grid_spec=pltpu.PrefetchScalarGridSpec(
            num_scalar_prefetch=0,
            grid=(n_split, n, j_grid),
            in_specs=[
                pl.BlockSpec((1, c, s_rows, 128), logits_map),   # logits
                pl.BlockSpec((1, 1, s_rows, 128), target_map),   # target
            ],
            out_specs=pl.BlockSpec((1, 1, 1, 128), lambda s, i, j: (s, i, 0, 0)),
            scratch_shapes=[pltpu.VMEM((8, 128), jnp.float32)],
        ),
        compiler_params=pltpu.CompilerParams(
            dimension_semantics=("parallel", "parallel", "arbitrary")),
    )(x4, tgt4)

    rows = n * hw
    scale = (1.0 / rows) if size_average else 1.0
    return jnp.sum(partials[:, :, 0, 0]) * scale


def _focal_loss_ref(x, target, gamma=0.0, alpha=(0.5, 0.5), size_average=True):
    # pure-JAX reference mirroring the PyTorch forward.
    if x.ndim > 2:
        n, c = x.shape[0], x.shape[1]
        x = jnp.transpose(x.reshape(n, c, -1), (0, 2, 1)).reshape(-1, c)
    t = target.reshape(-1).astype(jnp.int32)
    logp = jax.nn.log_softmax(x.astype(jnp.float32), axis=1)
    logpt = jnp.take_along_axis(logp, t[:, None], axis=1)[:, 0]
    pt = jnp.exp(logpt)
    at = jnp.asarray(alpha, jnp.float32)[t]
    logpt = logpt * at
    loss = -((1.0 - pt) ** gamma) * logpt
    return loss.mean() if size_average else loss.sum()


if __name__ == "__main__":
    key = jax.random.PRNGKey(0)
    k1, k2, k3, k4, k5, k6 = jax.random.split(key, 6)

    # Config 1: module defaults (gamma=0, alpha=(0.5, 0.5)), 128-aligned HW.
    N, C, H, W = 2, 2, 16, 16
    x = jax.random.normal(k1, (N, C, H, W), dtype=jnp.float32)
    target = jax.random.randint(k2, (N, H, W), 0, C, dtype=jnp.int32)
    loss = jax.block_until_ready(
        focal_loss(x, target, gamma=0.0, alpha=(0.5, 0.5), size_average=True))
    ref = jax.block_until_ready(_focal_loss_ref(x, target, gamma=0.0))
    assert jnp.allclose(loss, ref, rtol=1e-5, atol=1e-6), (loss, ref)

    # Config 2: gamma=2, non-uniform alpha, ragged spatial tail (15x15).
    x2 = jax.random.normal(k3, (N, C, 15, 15), dtype=jnp.float32)
    t2 = jax.random.randint(k4, (N, 15, 15), 0, C, dtype=jnp.int32)
    loss2 = jax.block_until_ready(
        focal_loss(x2, t2, gamma=2.0, alpha=(0.25, 0.75), size_average=True))
    ref2 = jax.block_until_ready(
        _focal_loss_ref(x2, t2, gamma=2.0, alpha=(0.25, 0.75)))
    assert jnp.allclose(loss2, ref2, rtol=1e-5, atol=1e-6), (loss2, ref2)

    # Config 3: C=4 general select-chain path, odd N -> 2-way spatial split,
    # forced small tile to exercise the split + clamped tail block.
    x3 = jax.random.normal(k5, (1, 4, 48, 64), dtype=jnp.float32)
    t3 = jax.random.randint(k6, (1, 48, 64), 0, 4, dtype=jnp.int32)
    loss3 = jax.block_until_ready(
        focal_loss(x3, t3, gamma=2.0, alpha=(0.1, 0.2, 0.3, 0.4),
                   size_average=True, tile_hw=1024))
    ref3 = jax.block_until_ready(
        _focal_loss_ref(x3, t3, gamma=2.0, alpha=(0.1, 0.2, 0.3, 0.4)))
    assert jnp.allclose(loss3, ref3, rtol=1e-5, atol=1e-6), (loss3, ref3)

    print("KERNEL_OK")
</pallas_src>

<mosaic_0001>
module attributes {stable_mosaic.version = 11 : i64} {
  func.func @_focal_loss_kernel(%arg0: i32, %arg1: i32, %arg2: i32, %arg3: memref<1x2x8x128xf32, #tpu.memory_space<vmem>>, %arg4: memref<1x1x8x128xi32, #tpu.memory_space<vmem>>, %arg5: memref<1x1x1x128xf32, #tpu.memory_space<vmem>>, %arg6: memref<8x128xf32, #tpu.memory_space<vmem>>) attributes {dimension_semantics = [#tpu.dimension_semantics<parallel>, #tpu.dimension_semantics<parallel>, #tpu.dimension_semantics<arbitrary>], iteration_bounds = array<i64: 1, 2, 1>, scalar_prefetch = 0 : i64, scratch_operands = 1 : i64, tpu.core_type = #tpu.core_type<tc>, window_params = [{transform_indices = @transform_0, window_bounds = array<i64: 1, 2, 8, 128>}, {transform_indices = @transform_1, window_bounds = array<i64: 1, 1, 8, 128>}, {transform_indices = @transform_2, window_bounds = array<i64: 1, 1, 1, 128>}]} {
    %c0_i32 = arith.constant 0 : i32
    %0 = arith.cmpi eq, %arg2, %c0_i32 : i32
    %1 = arith.extui %0 : i1 to i32
    %c0_i32_0 = arith.constant 0 : i32
    %2 = arith.cmpi ne, %1, %c0_i32_0 : i32
    scf.if %2 {
      %cst_22 = arith.constant 0.000000e+00 : f32
      %58 = vector.broadcast %cst_22 : f32 to vector<8x128xf32>
      %c0_23 = arith.constant 0 : index
      %c0_24 = arith.constant 0 : index
      %59 = vector.load %arg6[%c0_23, %c0_24] : memref<8x128xf32, #tpu.memory_space<vmem>>, vector<8x128xf32>
      tpu.vector_store %arg6[%c0_23, %c0_24], %58 {strides = array<i32>} : memref<8x128xf32, #tpu.memory_space<vmem>>, vector<8x128xf32>,
    } else {
    }
    %c0 = arith.constant 0 : index
    %c0_1 = arith.constant 0 : index
    %c0_2 = arith.constant 0 : index
    %c0_3 = arith.constant 0 : index
    %3 = vector.load %arg3[%c0, %c0_1, %c0_2, %c0_3] : memref<1x2x8x128xf32, #tpu.memory_space<vmem>>, vector<1x2x8x128xf32>
    %4 = vector.shape_cast %3 : vector<1x2x8x128xf32> to vector<2x8x128xf32>
    %c0_4 = arith.constant 0 : index
    %c0_5 = arith.constant 0 : index
    %c0_6 = arith.constant 0 : index
    %c0_7 = arith.constant 0 : index
    %5 = vector.load %arg4[%c0_4, %c0_5, %c0_6, %c0_7] : memref<1x1x8x128xi32, #tpu.memory_space<vmem>>, vector<1x1x8x128xi32>
    %6 = vector.shape_cast %5 : vector<1x1x8x128xi32> to vector<8x128xi32>
    %c0_i32_8 = arith.constant 0 : i32
    %7 = vector.broadcast %c0_i32_8 : i32 to vector<8x128xi32>
    %8 = arith.cmpi eq, %6, %7 : vector<8x128xi32>
    %9 = vector.extract_strided_slice %4 {offsets = [0, 0, 0], sizes = [1, 8, 128], strides = [1, 1, 1]} : vector<2x8x128xf32> to vector<1x8x128xf32>
    %10 = vector.shape_cast %9 : vector<1x8x128xf32> to vector<8x128xf32>
    %11 = vector.extract_strided_slice %4 {offsets = [1, 0, 0], sizes = [1, 8, 128], strides = [1, 1, 1]} : vector<2x8x128xf32> to vector<1x8x128xf32>
    %12 = vector.shape_cast %11 : vector<1x8x128xf32> to vector<8x128xf32>
    %13 = arith.select %8, %10, %12 : vector<8x128xi1>, vector<8x128xf32>
    %14 = vector.extract_strided_slice %4 {offsets = [1, 0, 0], sizes = [1, 8, 128], strides = [1, 1, 1]} : vector<2x8x128xf32> to vector<1x8x128xf32>
    %15 = vector.shape_cast %14 : vector<1x8x128xf32> to vector<8x128xf32>
    %16 = vector.extract_strided_slice %4 {offsets = [0, 0, 0], sizes = [1, 8, 128], strides = [1, 1, 1]} : vector<2x8x128xf32> to vector<1x8x128xf32>
    %17 = vector.shape_cast %16 : vector<1x8x128xf32> to vector<8x128xf32>
    %18 = arith.select %8, %15, %17 : vector<8x128xi1>, vector<8x128xf32>
    %19 = arith.subf %18, %13 : vector<8x128xf32>
    %cst = arith.constant 0.000000e+00 : f32
    %20 = vector.broadcast %cst : f32 to vector<8x128xf32>
    %21 = arith.maximumf %19, %20 : vector<8x128xf32>
    %22 = math.absf %19 : vector<8x128xf32>
    %cst_9 = arith.constant 0.000000e+00 : f32
    %23 = vector.broadcast %cst_9 : f32 to vector<8x128xf32>
    %24 = arith.subf %23, %22 : vector<8x128xf32>
    %25 = math.exp %24 : vector<8x128xf32>
    %26 = math.log1p %25 : vector<8x128xf32>
    %27 = arith.addf %21, %26 : vector<8x128xf32>
    %cst_10 = arith.constant 0.000000e+00 : f32
    %28 = vector.broadcast %cst_10 : f32 to vector<8x128xf32>
    %29 = arith.subf %28, %27 : vector<8x128xf32>
    %cst_11 = arith.constant 5.000000e-01 : f32
    %cst_12 = arith.constant 5.000000e-01 : f32
    %30 = vector.broadcast %cst_11 : f32 to vector<8x128xf32>
    %31 = vector.broadcast %cst_12 : f32 to vector<8x128xf32>
    %32 = arith.select %8, %30, %31 : vector<8x128xi1>, vector<8x128xf32>
    %33 = arith.mulf %32, %29 : vector<8x128xf32>
    %cst_13 = arith.constant 0.000000e+00 : f32
    %34 = vector.broadcast %cst_13 : f32 to vector<8x128xf32>
    %35 = arith.subf %34, %33 : vector<8x128xf32>
    %c1_i32 = arith.constant 1 : i32
    %36 = arith.muli %arg0, %c1_i32 : i32
    %37 = arith.addi %36, %arg2 : i32
    %c8_i32 = arith.constant 8 : i32
    %38 = arith.muli %37, %c8_i32 : i32
    %39 = tpu.iota {dimensions = array<i32: 0>} : vector<8x128xi32>
    %40 = vector.broadcast %38 : i32 to vector<8x128xi32>
    %41 = arith.addi %39, %40 : vector<8x128xi32>
    %42 = tpu.iota {dimensions = array<i32: 1>} : vector<8x128xi32>
    %c128_i32 = arith.constant 128 : i32
    %43 = vector.broadcast %c128_i32 : i32 to vector<8x128xi32>
    %44 = arith.muli %41, %43 : vector<8x128xi32>
    %45 = arith.addi %44, %42 : vector<8x128xi32>
    %c256_i32 = arith.constant 256 : i32
    %46 = vector.broadcast %c256_i32 : i32 to vector<8x128xi32>
    %47 = arith.cmpi slt, %45, %46 : vector<8x128xi32>
    %cst_14 = arith.constant 0.000000e+00 : f32
    %48 = vector.broadcast %cst_14 : f32 to vector<8x128xf32>
    %49 = arith.select %47, %35, %48 : vector<8x128xi1>, vector<8x128xf32>
    %c0_15 = arith.constant 0 : index
    %c0_16 = arith.constant 0 : index
    %50 = vector.load %arg6[%c0_15, %c0_16] : memref<8x128xf32, #tpu.memory_space<vmem>>, vector<8x128xf32>
    %51 = vector.shape_cast %49 : vector<8x128xf32> to vector<1x8x128xf32>
    %cst_17 = arith.constant dense<0.000000e+00> : vector<8x128xf32>
    %52 = vector.multi_reduction <add>, %51, %cst_17 [0] : vector<1x8x128xf32> to vector<8x128xf32>
    %53 = arith.addf %50, %52 : vector<8x128xf32>
    %c0_18 = arith.constant 0 : index
    %c0_19 = arith.constant 0 : index
    %54 = vector.load %arg6[%c0_18, %c0_19] : memref<8x128xf32, #tpu.memory_space<vmem>>, vector<8x128xf32>
    tpu.vector_store %arg6[%c0_18, %c0_19], %53 {strides = array<i32>} : memref<8x128xf32, #tpu.memory_space<vmem>>, vector<8x128xf32>,
    %c0_i32_20 = arith.constant 0 : i32
    %55 = arith.cmpi eq, %arg2, %c0_i32_20 : i32
    %56 = arith.extui %55 : i1 to i32
    %c0_i32_21 = arith.constant 0 : i32
    %57 = arith.cmpi ne, %56, %c0_i32_21 : i32
    scf.if %57 {
      %c0_22 = arith.constant 0 : index
      %c0_23 = arith.constant 0 : index
      %58 = vector.load %arg6[%c0_22, %c0_23] : memref<8x128xf32, #tpu.memory_space<vmem>>, vector<8x128xf32>
      %59 = vector.shape_cast %58 : vector<8x128xf32> to vector<1x8x128xf32>
      %cst_24 = arith.constant dense<0.000000e+00> : vector<1xf32>
      %60 = vector.multi_reduction <add>, %59, %cst_24 [1, 2] : vector<1x8x128xf32> to vector<1xf32>
      %61 = vector.shape_cast %60 : vector<1xf32> to vector<1x1x1xf32>
      %62 = vector.extract %61[0, 0, 0] : f32 from vector<1x1x1xf32>
      %cst_25 = arith.constant 0.000000e+00 : f32
      %63 = vector.broadcast %cst_25 : f32 to vector<1x1x1x128xf32>
      %64 = vector.broadcast %62 : f32 to vector<1x1x1x128xf32>
      %65 = arith.addf %63, %64 : vector<1x1x1x128xf32>
      %c0_26 = arith.constant 0 : index
      %c0_27 = arith.constant 0 : index
      %c0_28 = arith.constant 0 : index
      %c0_29 = arith.constant 0 : index
      %66 = vector.load %arg5[%c0_26, %c0_27, %c0_28, %c0_29] : memref<1x1x1x128xf32, #tpu.memory_space<vmem>>, vector<1x1x1x128xf32>
      tpu.vector_store %arg5[%c0_26, %c0_27, %c0_28, %c0_29], %65 {strides = array<i32>} : memref<1x1x1x128xf32, #tpu.memory_space<vmem>>, vector<1x1x1x128xf32>,
    } else {
    }
    return
  }
  func.func @transform_0(%arg0: i32, %arg1: i32, %arg2: i32) -> (i32, i32, i32, i32) {
    %c1_i32 = arith.constant 1 : i32
    %0 = arith.muli %arg0, %c1_i32 : i32
    %1 = arith.addi %0, %arg2 : i32
    %c0_i32 = arith.constant 0 : i32
    %2 = arith.minsi %1, %c0_i32 : i32
    %c0_i32_0 = arith.constant 0 : i32
    %c0_i32_1 = arith.constant 0 : i32
    %c0_i32_2 = arith.constant 0 : i32
    return %arg1, %c0_i32_0, %2, %c0_i32_1 : i32, i32, i32, i32
  }
  func.func @transform_1(%arg0: i32, %arg1: i32, %arg2: i32) -> (i32, i32, i32, i32) {
    %c1_i32 = arith.constant 1 : i32
    %0 = arith.muli %arg0, %c1_i32 : i32
    %1 = arith.addi %0, %arg2 : i32
    %c0_i32 = arith.constant 0 : i32
    %2 = arith.minsi %1, %c0_i32 : i32
    %c0_i32_0 = arith.constant 0 : i32
    %c0_i32_1 = arith.constant 0 : i32
    %c0_i32_2 = arith.constant 0 : i32
    return %arg1, %c0_i32_0, %2, %c0_i32_1 : i32, i32, i32, i32
  }
  func.func @transform_2(%arg0: i32, %arg1: i32, %arg2: i32) -> (i32, i32, i32, i32) {
    %c0_i32 = arith.constant 0 : i32
    %c0_i32_0 = arith.constant 0 : i32
    %c0_i32_1 = arith.constant 0 : i32
    return %arg0, %arg1, %c0_i32, %c0_i32_0 : i32, i32, i32, i32
  }
}

</mosaic_0001>

<bundles_post_ra>
// kernel: tpu_custom_call.1
= control target key start
LH: loop header
LB: loop body
LE: loop exit
PB: predicated region body
PF: predicated region fallthrough
CT: control target
= control target key end

     0   :  { %7 = vsyncpa [#allocation4], 0  ;;  %s839_s0 = inlined_call_operand.hbm [shape: f32[2,2,2,128], index: 0, kind: input, shape index: {}]   ;;  %s840_s1 = inlined_call_operand.hbm [shape: s32[2,1,2,128], index: 1, kind: input, shape index: {}]   ;;  %s841_s2 = inlined_call_operand.hbm [shape: f32[1,2,1,128], index: 2, kind: output, shape index: {}]  }
   0x1   :  { %9 = vsyncpa [#allocation4 + $0x1], 0 }
   0x2   :  { %10 = vsyncpa [#allocation7], 0 }
   0x3   :  { %12 = vsyncpa [#allocation7 + $0x1], 0 }
   0x4   :  { %13 = vsyncpa [#allocation5], 0 }
   0x5   :  { %15 = vsyncpa [#allocation5 + $0x1], 0  ;;  %s704_s9 = smov 0   ;;  %s706_s10 = smov 0  }
   0x6   :  { %s708_s11 = smov 0   ;;  %s710_s12 = smov 0  }
   0x7   :  { %s712_s13 = smov 0   ;;  %s714_s14 = smov 0  }
   0x8 LB: > { %s483_s15 = sadd.s32 4294967295, %s680_s14   ;;  %s484_s16 = sadd.s32 4294967294, %s680_s14   ;;  %s680_s14 = sphi %s714_s14, %s21_s14   ;;  %s676_s13 = sphi %s712_s13, %s850_s13   ;;  %s672_s12 = sphi %s710_s12, %s849_s12   ;;  %s668_s11 = sphi %s708_s11, %s848_s11   ;;  %s664_s10 = sphi %s706_s10, %s847_s10   ;;  %s660_s9 = sphi %s704_s9, %s846_s9  }
   0x9   : > { %s36_s17 = sadd.s32 1, %s676_s13  ;;  %s55_s18 = sadd.s32 1, %s668_s11 }
   0xa   : > { %p38_p0 = scmp.ge.s32.totalorder %s36_s17, 2  ;;  %p62_p1 = scmp.ne.s32.totalorder %s668_s11, %s664_s10 }
   0xb   : > { %p63_p2 = scmp.eq.s32.totalorder %s680_s14, 0  ;;  %p68_p3 = scmp.ne.s32.totalorder %s664_s10, %s660_s9 }
   0xc   : > { %s852_s17 = smov (%p38_p0, %s36_s17), 0  ;;  %p69_p5 = scmp.eq.s32.totalorder %s483_s15, 0 }
   0xd   : > { %p745_p4 = por %p63_p2, %p62_p1  ;;  %s50_s20 = ssub.s32 %s676_s13, %s852_s17 }
   0xe   : > { %p128_p6 = scmp.eq.s32.totalorder %s483_s15, 1  ;;  %p53_p7 = scmp.eq.s32.totalorder %s50_s20, 0 }
   0xf   : > { %p751_p8 = por %p69_p5, %p68_p3  ;;  %p134_p10 = scmp.eq.s32.totalorder %s484_s16, 1 }
  0x10   : > { %p755_p9 = por %p128_p6, %p62_p1  ;;  %p486_p12 = scmp.ge.s32.totalorder %s680_s14, 2 }
  0x11   : > { %s760_s23 = scalar_select %p53_p7, %s668_s11, %s55_s18  }
  0x12   : > { %p762_p11 = por %p134_p10, %p68_p3  ;;  %150 = sbr.rel (%p486_p12) target bundleno = 50 (0x32), region = 16 }
  0x17   : > { %153 = sbr.rel (!%p745_p4) target bundleno = 41 (0x29), region = 20 }
  0x1c   : > { %s154_s25 = sand.u32 1, %s668_s11  }
  0x1d   : > { %s487_s26 = sshll.u32 %s154_s25, 4  ;;  %s155_s27 = scalar_lea.sflag [#allocation4], %s154_s25 }
  0x1e   : > { %s158_s28 = scalar_lea.vmem [#allocation3], %s487_s26 }
  0x1f   : > { %167 = vsyncadd %s155_s27, 192  ;;  %s499_s29 = sshll.u32 %s676_s13, 2  ;;  %s179_s30 = sld [smem:[#allocation0]]  }
  0x20   : > { %s172_s5 = scalar_lea.hbm %s839_s0, %s499_s29  ;;  %s189_s6 = sshll.u32 %s158_s28, 4  ;;  %s190_s6 = int_to_ptr.vmem [resolvable:$true] %s189_s6 }
  0x21   : > { %s187_s7 = sshll.u32 %s172_s5, 4  ;;  %s682_s8 = smov 32   ;;  %s188_s7 = int_to_ptr.hbm [resolvable:$true] %s187_s7 }
  0x22   : > { %196 = sst [smem:[#allocation10]] %s682_s8  ;;  %s683_s15 = smov 128  }
  0x23   : > { %198 = sst [smem:[#allocation10 + $0x1]] %s683_s15  ;;  %s684_s18 = smov 1  }
  0x24   : > { %200 = sst [smem:[#allocation10 + $0x2]] %s684_s18  ;;  %s685_s25 = smov 2  }
  0x25   : > { %s490_s16 = sshll.u32 %s179_s30, 26  ;;  %202 = sst [smem:[#allocation10 + $0x3]] %s682_s8 }
  0x26   : > { %s491_s20 = sadd.s32 134217728, %s490_s16  ;;  %204 = sst [smem:[#allocation10 + $0x4]] %s682_s8 }
  0x27   : > { %206 = sst [smem:[#allocation10 + $0x5]] %s685_s25  ;;  %s686_s26 = smov [#allocation9]  }
  0x28   : > { %208 = dma.general %s188_s7, 64, %s190_s6, %s155_s27, %s686_s26, [#allocation10], %s491_s20, 0  }
  0x29 PF: > { %211 = sbr.rel (!%p745_p4) target bundleno = 50 (0x32), region = 24  ;;  %s212_s28 = sand.u32 (%p745_p4), 1, %s668_s11  }
  0x2a   : > { %s492_s29 = sshll.u32 (%p745_p4), %s212_s28, 3  ;;  %s213_s3 = scalar_lea.sflag (%p745_p4), [#allocation7], %s212_s28 }
  0x2b   : > { %s216_s4 = scalar_lea.vmem (%p745_p4), [#allocation6], %s492_s29 }
  0x2e   : > { %225 = vsyncadd %s213_s3, 96  ;;  %s493_s30 = sshll.u32 %s676_s13, 1  ;;  %s233_s5 = sshll.u32 %s216_s4, 4  ;;  %s234_s5 = int_to_ptr.vmem [resolvable:$true] %s233_s5 }
  0x2f   : > { %s229_s8 = scalar_lea.hbm %s840_s1, %s493_s30  ;;  %s687_s27 = smov 32  }
  0x30   : > { %s231_s18 = sshll.u32 %s229_s8, 4  ;;  %s688_s6 = smov 2   ;;  %s232_s18 = int_to_ptr.hbm [resolvable:$true] %s231_s18 }
  0x31   : > { %239 = dma.hbm_to_vmem [thread:$0]  %s232_s18, 32, %s234_s5, %s213_s3, %s687_s27, %s687_s27, %s688_s6  }
  0x32 PF: > { %p494_p13 = scmp.ge.s32.totalorder %s680_s14, 1  ;;  %p241_p0 = scmp.lt.s32.totalorder %s680_s14, 3 }
  0x34   : > { %p242_p1 = pnand %p494_p13, %p241_p0 }
  0x35   : > { %s786_s19 = sand.u32 (!%p242_p1), 1, %s664_s10  }
  0x36   : > { %245 = sbr.rel (%p242_p1) target bundleno = 285 (0x11d), region = 28  ;;  %s495_s7 = sshll.u32 (!%p242_p1), %s786_s19, 4 }
  0x37   : > { %s248_s20 = scalar_lea.sflag (!%p242_p1), [#allocation4], %s786_s19  ;;  %s251_s25 = scalar_lea.vmem (!%p242_p1), [#allocation3], %s495_s7 }
  0x3b   : > { %647 = dma.done.wait (%p751_p8), %s248_s20, 256  }
  0x3c   : > { %649 = vsyncadd (%p751_p8), %s248_s20, 4294967040  ;;  %s496_s26 = sshll.u32 %s786_s19, 3  ;;  %s258_s28 = scalar_lea.sflag [#allocation7], %s786_s19 }
  0x3d   : > { %s261_s29 = scalar_lea.vmem [#allocation6], %s496_s26 }
  0x3e   : > { %651 = dma.done.wait (%p751_p8), %s258_s28, 128  }
  0x3f   : > { %653 = vsyncadd (%p751_p8), %s258_s28, 4294967168  ;;  %v304_v0 = vld [vmem:[%s251_s25] sm:$0xff]  ;;  %v305_v1 = vld [vmem:[%s251_s25 + $0x8] sm:$0xff]  ;;  %v331_v12 = vlaneseq  ;;  %s372_s4 = scalar_lea.hbm %s841_s2, %s672_s12  ;;  %s286_s30 = scalar_lea.vmem [#allocation8], %s786_s19 }
  0x40   : > { %v306_v2 = vld [vmem:[%s261_s29] sm:$0xff]  ;;  %s374_s5 = sshll.u32 %s286_s30, 4  ;;  %s376_s15 = sshll.u32 %s372_s4, 4  ;;  %s375_s5 = int_to_ptr.vmem [resolvable:$true] %s374_s5  ;;  %s377_s15 = int_to_ptr.hbm [resolvable:$true] %s376_s15 }
  0x41   : > { %vm307_vm0 = vcmp.eq.s32.totalorder %v306_v2, 0  ;;  %v332_v15 = vshrl.u32 %v331_v12, 7  ;;  %v336_v20 = vand.u32 127, %v331_v12  ;;  %s362_s8 = scalar_lea.sflag [#allocation5], %s786_s19  ;;  %s608_s18 = sshra.s32 %s377_s15, 4  ;;  %s609_s18 = int_to_ptr.hbm [resolvable:$true] %s608_s18 }
  0x42   : > { %v308_v3 = vsel %vm307_vm0, %v304_v0, %v305_v1  ;;  %v309_v4 = vsel %vm307_vm0, %v305_v1, %v304_v0  ;;  %s610_s27 = scalar_lea.hbm %s609_s18, 1  ;;  %s614_s12 = scalar_lea.hbm %s841_s2, 2 }
  0x43   : > { %v310_v5 = vsub.f32 %v309_v4, %v308_v3  ;;  %v337_v21 = vmul.u32 128, %v332_v15  ;;  %p611_p2 = scmp.ne.s32.totalorder %s609_s18, %s610_s27  ;;  %p615_p5 = scmp.lt.s32.totalorder %s609_s18, %s841_s2 }
  0x44   : > { %p616_p6 = scmp.lt.s32.totalorder %s614_s12, %s610_s27 }
  0x45   : > { %v312_v6 = vand.u32 2147483647, %v310_v5  ;;  %v311_v18 = vmax.f32 %v310_v5, 0.0  ;;  %v338_v24 = vadd.s32 %v337_v21, %v336_v20  ;;  %p612_p3 = pnand %p611_p2, %p755_p9 }
  0x46   : > { %p617_p7 = por %p616_p6, %p615_p5 }
  0x47   : > { %v313_v7 = vsub.f32 0.0, %v312_v6  ;;  %vm339_vm2 = vcmp.lt.s32.totalorder %v338_v24, 256  ;;  %p613_p4 = pneg %p612_p3 }
  0x49   : > { %v314_v8 = vmul.f32 1.442695, %v313_v7  ;;  %p618_p8 = pnand %p617_p7, %p613_p4 }
  0x4b   : > { %566 = vpow2.f32 %v314_v8 }
  0x51   : > { %v567_v9 = vpop.eup %566 }
  0x52   : > { %v316_v10 = vadd.f32 1.0, %v567_v9  ;;  %v319_v11 = vmul.f32 -0.5, %v567_v9  ;;  %v322_v14 = vand.u32 2147483647, %v567_v9 }
  0x54   : > { %568 = vlog2.f32 %v316_v10  ;;  %v320_v13 = vadd.f32 1.0, %v319_v11  ;;  %vm323_vm1 = vcmp.lt.f32.partialorder %v322_v14, 0.0004427343 }
  0x56   : > { %v321_v16 = vmul.f32 %v567_v9, %v320_v13 }
  0x5a   : > { %v569_v17 = vpop.eup %568 }
  0x5b   : > { %v318_v19 = vmul.f32 0.6931472, %v569_v17 }
  0x5d   : > { %v324_v22 = vsel %vm323_vm1, %v321_v16, %v318_v19 }
  0x5e   : > { %v325_v23 = vadd.f32 %v324_v22, %v311_v18 }
  0x60   : > { %v326_v25 = vsub.f32 0.0, %v325_v23 }
  0x62   : > { %v327_v26 = vmul.f32 0.5, %v326_v25 }
  0x64   : > { %v328_v27 = vsub.f32 0.0, %v327_v26 }
  0x66   : > { %v340_v28 = vsel %vm339_vm2, %v328_v27, 0.0 }
  0x67   : > { %349 = vadd.xlane.f32.xlu0 %v340_v28 }
  0xda   : > { %v350_v29 = vpop.xlane.xlu0 %349 }
  0xdb   : > { %v351_v30 = vrot.slane %v350_v29, 4 }
  0xdd   : > { %v352_v31 = vadd.f32 %v351_v30, %v350_v29 }
  0xdf   : > { %v353_v32 = vrot.slane %v352_v31, 2 }
  0xe1   : > { %v354_v33 = vadd.f32 %v353_v32, %v352_v31 }
  0xe3   : > { %v355_v34 = vrot.slane %v354_v33, 1 }
  0xe5   : > { %v356_v35 = vadd.f32 %v355_v34, %v354_v33 }
  0xe7   : > { %500 = vpush %v356_v35 }
 0x118   : > { %s501_s16 = spop %500 }
 0x119   : > { %v358_v36 = vstv %s501_s16 }
 0x11a   : > { %360 = vst [vmem:[%s286_s30] sm:$0x1] %v358_v36 }
 0x11b   : > { %621 = shalt.err (!%p618_p8)
}
 0x11c   : > { %504 = dma.vmem_to_hbm [thread:$0]  (%p755_p9), %s375_s5, 16, %s377_s15, %s362_s8  }
 0x11d PF: > { %s388_s19 = sand.u32 1, %s660_s9   ;;  %p507_p10 = pnand %p486_p12, %p762_p11 }
 0x11e   : > { %s389_s26 = scalar_lea.sflag [#allocation5], %s388_s19 }
 0x11f   : > { %p508_p13 = pneg %p507_p10 }
 0x121   : > { %655 = dma.done.wait (%p508_p13), %s389_s26, 16  }
 0x122   : > { %657 = vsyncadd (%p508_p13), %s389_s26, 4294967280  ;;  %s21_s14 = sadd.s32 1, %s680_s14   ;;  %s846_s9 = smov %s664_s10 }
 0x123   : > { %p18_p0 = scmp.ge.s32.totalorder %s21_s14, 4   ;;  %s847_s10 = smov %s668_s11 }
 0x124   : > { %s848_s11 = smov %s760_s23  ;;  %s849_s12 = smov %s676_s13 }
 0x125   : > { %s850_s13 = smov %s852_s17  ;;  %20 = sbr.rel (!%p18_p0) target bundleno = 8 (0x8), region = 99 }
 0x12a   :  { %394 = vsyncpa [#allocation4], 1 }
 0x12b   :  { %396 = vsyncpa [#allocation4 + $0x1], 1 }
 0x12c   :  { %397 = vsyncpa [#allocation7], 1 }
 0x12d   :  { %399 = vsyncpa [#allocation7 + $0x1], 1 }
 0x12e   :  { %400 = vsyncpa [#allocation5], 1 }
 0x12f   :  { %402 = vsyncpa [#allocation5 + $0x1], 1 }

</bundles_post_ra>
